<compile_context>
chip_gen: v7x
topology: tpu7x:2x2x1
jax: 0.10.0
libtpu: 0.0.40
codegen_flags: <defaults>
</compile_context>

<pallas_src>
import jax
import jax.numpy as jnp
from jax.experimental import pallas as pl
from jax.experimental.pallas import tpu as pltpu


def _pair_halve_kernel(x_ref, w_ref, sel_ref, o_ref):
    # x_ref: (tb, 2*NB)  w_ref: (1, 2*NB)  sel_ref: (2*NB, NB)  o_ref: (tb, NB)
    xw = x_ref[...] * w_ref[...]                      # VPU pre-scale (broadcast row)
    o_ref[...] = jnp.dot(                              # MXU 0/1 pair-selection sum
        xw, sel_ref[...], preferred_element_type=jnp.float32
    ).astype(o_ref.dtype)


def _pick_lane_block(half):
    # 256-wide N fills the 256x256 MXU on v6e/v7x in one push; 128 is native
    # on v5e's 128x128 MXUs.  Fall back to the full half when it is small /
    # not lane-aligned (block == full array dim is always legal).
    if half % 256 == 0:
        return 256
    if half % 128 == 0:
        return 128
    return half


def _vmem_capacity_bytes():
    try:
        return int(pltpu.get_tpu_info().vmem_capacity_bytes)
    except Exception:
        return 64 << 20  # conservative (v7x physical VMEM per TC)


def pair_linear_halve_forward(x, weight, *, max_tile_bs=1024):
    """Pallas implementation of PairLinearHalve.forward.

    x:      (bs, dim), dim even
    weight: (dim//2, 2)
    returns (bs, dim//2)
    """
    bs, dim = x.shape
    assert dim % 2 == 0, "Input dim must be even number"
    half = dim // 2
    assert weight.shape == (half, 2)

    nb = _pick_lane_block(half)            # output-column block (lanes)
    kb = 2 * nb                            # matching x-column block
    num_col_blocks = half // nb

    itemsize = jnp.dtype(x.dtype).itemsize

    # Batch tile: biggest multiple of 8 whose double-buffered x/out tiles fit a
    # modest VMEM budget (tiles are per column block, so this is small even at
    # huge dim).  Keep tb a multiple of 8 so partial tiles stay sublane-aligned.
    tile_budget = 24 << 20
    per_row = 2 * (kb + nb) * itemsize     # double-buffered x tile + out tile
    tb_cap = max(8, (tile_budget // per_row) // 8 * 8)
    tb_cap = min(tb_cap, max_tile_bs)
    tb = bs if bs <= tb_cap else tb_cap

    grid = (pl.cdiv(bs, tb), num_col_blocks)

    # Lane-interleaved weight row: w_row[0, 2p + j] = weight[p, j].
    w_row = weight.astype(x.dtype).reshape(1, dim)

    # Constant 0/1 pair-selection slab: sel[r, q] = (r // 2 == q).
    rows = jax.lax.broadcasted_iota(jnp.int32, (kb, nb), 0)
    cols = jax.lax.broadcasted_iota(jnp.int32, (kb, nb), 1)
    sel = ((rows // 2) == cols).astype(x.dtype)

    # Generation-aware VMEM limit: actual need (double-buffered tiles + resident
    # sel slab + w_row) plus headroom, capped below physical capacity.
    vmem_cap = max((16 << 20), _vmem_capacity_bytes() - (8 << 20))
    needed = 2 * (tb * kb + tb * nb + kb + kb * nb) * itemsize
    vmem_limit = int(min(vmem_cap, max(needed + (4 << 20), 16 << 20)))

    cost = pl.CostEstimate(
        flops=int(2 * bs * kb * half),                       # MXU MACs actually issued
        transcendentals=0,
        bytes_accessed=int(itemsize * (bs * dim + bs * half + dim + kb * nb)),
    )

    return pl.pallas_call(
        _pair_halve_kernel,
        out_shape=jax.ShapeDtypeStruct((bs, half), x.dtype),
        grid=grid,
        in_specs=[
            pl.BlockSpec((tb, kb), lambda i, k: (i, k)),     # x column/batch tile
            pl.BlockSpec((1, kb), lambda i, k: (0, k)),      # interleaved weight row
            pl.BlockSpec((kb, nb), lambda i, k: (0, 0)),     # constant sel slab (resident)
        ],
        out_specs=pl.BlockSpec((tb, nb), lambda i, k: (i, k)),
        compiler_params=pltpu.CompilerParams(
            dimension_semantics=("parallel", "parallel"),
            vmem_limit_bytes=vmem_limit,
        ),
        cost_estimate=cost,
    )(x, w_row, sel)


def pair_linear_halve_reference(x, weight):
    # out[b, p] = x[b, 2p] * w[p, 0] + x[b, 2p+1] * w[p, 1]
    return x[:, 0::2] * weight[:, 0][None, :] + x[:, 1::2] * weight[:, 1][None, :]


if __name__ == "__main__":
    # Small shapes consistent with the module: batch=8, input_dim=128.
    bs, input_dim = 8, 128
    half = input_dim // 2

    key = jax.random.PRNGKey(0)
    kx, kw = jax.random.split(key)
    x = jax.random.normal(kx, (bs, input_dim), dtype=jnp.float32)

    # Deterministic parameter init, exactly as PairLinearHalve.__init__:
    # [0.5, 0.5] repeated for every pair -> (dim//2, 2).
    w_init = jnp.tile(jnp.array([[0.5, 0.5]], dtype=jnp.float32), (half, 1))

    out = jax.block_until_ready(pair_linear_halve_forward(x, w_init))
    assert out.shape == (bs, half)
    ref = pair_linear_halve_reference(x, w_init)
    assert jnp.allclose(out, ref, atol=1e-5, rtol=1e-5), "halve-weight mismatch"
    assert jnp.allclose(out, 0.5 * (x[:, 0::2] + x[:, 1::2]), atol=1e-5), \
        "init weight must average each adjacent pair"

    # Exercise the general weighted-pair path with non-trivial weights.
    w_rand = jax.random.normal(kw, (half, 2), dtype=jnp.float32)
    out2 = jax.block_until_ready(pair_linear_halve_forward(x, w_rand))
    ref2 = pair_linear_halve_reference(x, w_rand)
    assert jnp.allclose(out2, ref2, atol=1e-5, rtol=1e-5), "random-weight mismatch"

    # TODO(synk): only the forward pass is implemented; the custom CUDA backward
    # (bmm2x2_cuda.backward_2x1) is not translated.
    print("KERNEL_OK")
</pallas_src>

<mosaic_0001>
module attributes {stable_mosaic.version = 11 : i64} {
  func.func @_pair_halve_kernel(%arg0: i32, %arg1: i32, %arg2: memref<8x128xf32, #tpu.memory_space<vmem>>, %arg3: memref<1x128xf32, #tpu.memory_space<vmem>>, %arg4: memref<128x64xf32, #tpu.memory_space<vmem>>, %arg5: memref<8x64xf32, #tpu.memory_space<vmem>>) attributes {dimension_semantics = [#tpu.dimension_semantics<parallel>, #tpu.dimension_semantics<parallel>], iteration_bounds = array<i64: 1, 1>, scalar_prefetch = 0 : i64, scratch_operands = 0 : i64, tpu.core_type = #tpu.core_type<tc>, window_params = [{transform_indices = @transform_0, window_bounds = array<i64: 8, 128>}, {transform_indices = @transform_1, window_bounds = array<i64: 1, 128>}, {pipeline_mode = #tpu.pipeline_mode<synchronous>, transform_indices = @transform_2, window_bounds = array<i64: 128, 64>}, {transform_indices = @transform_3, window_bounds = array<i64: 8, 64>}]} {
    %c0 = arith.constant 0 : index
    %c0_0 = arith.constant 0 : index
    %0 = vector.load %arg2[%c0, %c0_0] : memref<8x128xf32, #tpu.memory_space<vmem>>, vector<8x128xf32>
    %c0_1 = arith.constant 0 : index
    %c0_2 = arith.constant 0 : index
    %1 = vector.load %arg3[%c0_1, %c0_2] : memref<1x128xf32, #tpu.memory_space<vmem>>, vector<1x128xf32>
    %2 = vector.broadcast %1 : vector<1x128xf32> to vector<8x128xf32>
    %3 = arith.mulf %0, %2 : vector<8x128xf32>
    %c0_3 = arith.constant 0 : index
    %c0_4 = arith.constant 0 : index
    %4 = vector.load %arg4[%c0_3, %c0_4] : memref<128x64xf32, #tpu.memory_space<vmem>>, vector<128x64xf32>
    %cst = arith.constant dense<0.000000e+00> : vector<8x64xf32>
    %5 = tpu.matmul %3, %4, %cst {dimension_numbers = #tpu.dot_dimension_numbers<[1], [0], [0], [1], [0, 0, 1, 1], [], []>} : vector<8x128xf32>, vector<128x64xf32>, vector<8x64xf32> -> vector<8x64xf32>
    %c0_5 = arith.constant 0 : index
    %c0_6 = arith.constant 0 : index
    %6 = vector.load %arg5[%c0_5, %c0_6] : memref<8x64xf32, #tpu.memory_space<vmem>>, vector<8x64xf32>
    tpu.vector_store %arg5[%c0_5, %c0_6], %5 {strides = array<i32>} : memref<8x64xf32, #tpu.memory_space<vmem>>, vector<8x64xf32>,
    return
  }
  func.func @transform_0(%arg0: i32, %arg1: i32) -> (i32, i32) {
    %c0_i32 = arith.constant 0 : i32
    return %arg0, %arg1 : i32, i32
  }
  func.func @transform_1(%arg0: i32, %arg1: i32) -> (i32, i32) {
    %c0_i32 = arith.constant 0 : i32
    %c0_i32_0 = arith.constant 0 : i32
    return %c0_i32, %arg1 : i32, i32
  }
  func.func @transform_2(%arg0: i32, %arg1: i32) -> (i32, i32) {
    %c0_i32 = arith.constant 0 : i32
    %c0_i32_0 = arith.constant 0 : i32
    %c0_i32_1 = arith.constant 0 : i32
    return %c0_i32, %c0_i32_0 : i32, i32
  }
  func.func @transform_3(%arg0: i32, %arg1: i32) -> (i32, i32) {
    %c0_i32 = arith.constant 0 : i32
    return %arg0, %arg1 : i32, i32
  }
}

</mosaic_0001>

<bundles_post_ra>
// kernel: tpu_custom_call.1
= control target key start
LH: loop header
LB: loop body
LE: loop exit
PB: predicated region body
PF: predicated region fallthrough
CT: control target
= control target key end

     0   :  { %v231_v3 = vmov 0.0|0.0   ;;  %vm232_vm0 = vmmov 0   ;;  %v233_v6 = vmov 0.0   ;;  %s321_s0 = inlined_call_operand.vmem [shape: f32[8,128], index: 0, kind: input, shape index: {}]   ;;  %s322_s1 = inlined_call_operand.vmem [shape: f32[1,128], index: 1, kind: input, shape index: {}]   ;;  %s323_s2 = inlined_call_operand.vmem [shape: f32[128,64], index: 2, kind: input, shape index: {}]   ;;  %s324_s3 = inlined_call_operand.hbm [shape: f32[8,64], index: 3, kind: output, shape index: {}]  }
   0x1   :  { %v24_v0 = vld [vmem:[%s323_s2] sm:$0xff]  ;;  %v25_v1 = vld [vmem:[%s323_s2 + $0x8] sm:$0xff]  ;;  %v26_v2 = vld [vmem:[%s323_s2 + $0x10] sm:$0xff]  ;;  %179 = vmatprep.subr.bf16.mxu0 %v231_v3  ;;  %176 = vmatprep.mubr.msk.f32.mxu0 %vm232_vm0, %v233_v6 }
   0x2   :  { %v180_v4 = vpack.c.bf16 %v25_v1, %v24_v0  ;;  %v27_v5 = vld [vmem:[%s323_s2 + $0x18] sm:$0xff]  ;;  %v28_v8 = vld [vmem:[%s323_s2 + $0x20] sm:$0xff]  ;;  %v29_v9 = vld [vmem:[%s323_s2 + $0x28] sm:$0xff] }
   0x3   :  { %v183_v7 = vpack.c.bf16 %v27_v5, %v26_v2 }
   0x4   :  { %181 = vmatpush3.bf16.msra.mxu0 %v180_v4 }
   0x5   :  { %182 = vmatprep.subr.bf16.mxu0 %v231_v3 }
   0x6   :  { %8 = vsyncpa [#allocation3], 0  ;;  %v186_v10 = vpack.c.bf16 %v29_v9, %v28_v8  ;;  %v30_v11 = vld [vmem:[%s323_s2 + $0x30] sm:$0xff]  ;;  %v31_v12 = vld [vmem:[%s323_s2 + $0x38] sm:$0xff]  ;;  %s234_s21 = smov [#allocation2]   ;;  %vm110_vm1 = vcmask 523264  }
   0x7   :  { %v189_v13 = vpack.c.bf16 %v31_v12, %v30_v11  ;;  %v32_v14 = vld [vmem:[%s323_s2 + $0x40] sm:$0xff]  ;;  %v33_v15 = vld [vmem:[%s323_s2 + $0x48] sm:$0xff]  ;;  %v34_v17 = vld [vmem:[%s323_s2 + $0x50] sm:$0xff]  ;;  %s118_s22 = sshll.u32 %s234_s21, 4  ;;  %s119_s22 = int_to_ptr.vmem [resolvable:$true] %s118_s22 }
   0x8   :  { %184 = vmatpush3.bf16.msra.mxu0 %v183_v7  ;;  %v192_v16 = vpack.c.bf16 %v33_v15, %v32_v14  ;;  %v35_v18 = vld [vmem:[%s323_s2 + $0x58] sm:$0xff]  ;;  %v36_v20 = vld [vmem:[%s323_s2 + $0x60] sm:$0xff]  ;;  %v37_v21 = vld [vmem:[%s323_s2 + $0x68] sm:$0xff]  ;;  %p212_p1 = scmp.lt.s32.totalorder %s119_s22, %s119_s22 }
   0x9   :  { %185 = vmatprep.subr.bf16.mxu0 %v231_v3  ;;  %v195_v19 = vpack.c.bf16 %v35_v18, %v34_v17  ;;  %v198_v22 = vpack.c.bf16 %v37_v21, %v36_v20  ;;  %v38_v23 = vld [vmem:[%s323_s2 + $0x70] sm:$0xff]  ;;  %v39_v24 = vld [vmem:[%s323_s2 + $0x78] sm:$0xff]  ;;  %v15_v26 = vld [vmem:[%s321_s0] sm:$0xff]  ;;  %s207_s2 = scalar_lea.vmem %s119_s22, 128 }
   0xa   :  { %v201_v25 = vpack.c.bf16 %v39_v24, %v38_v23  ;;  %v126_v27 = vld [vmem:[%s322_s1] ss:$0 sm:$0xff]  ;;  %p208_p0 = scmp.ne.s32.totalorder %s119_s22, %s207_s2  ;;  %p213_p2 = scmp.lt.s32.totalorder %s207_s2, %s207_s2 }
   0xb   :  { %v23_v28 = vmul.f32 %v126_v27, %v15_v26 }
   0xc   :  { %187 = vmatpush3.bf16.msra.mxu0 %v186_v10  ;;  %p214_p3 = por %p213_p2, %p212_p1 }
   0xd   :  { %188 = vmatprep.subr.bf16.mxu0 %v231_v3 }
   0xe   :  { %p215_p4 = pnand %p214_p3, %p208_p0 }
  0x10   :  { %190 = vmatpush3.bf16.msra.mxu0 %v189_v13 }
  0x11   :  { %191 = vmatprep.subr.bf16.mxu0 %v231_v3 }
  0x14   :  { %193 = vmatpush3.bf16.msra.mxu0 %v192_v16 }
  0x15   :  { %194 = vmatprep.subr.bf16.mxu0 %v231_v3 }
  0x18   :  { %196 = vmatpush3.bf16.msra.mxu0 %v195_v19 }
  0x19   :  { %197 = vmatprep.subr.bf16.mxu0 %v231_v3 }
  0x1c   :  { %199 = vmatpush3.bf16.msra.mxu0 %v198_v22 }
  0x1d   :  { %200 = vmatprep.subr.bf16.mxu0 %v231_v3 }
  0x20   :  { %202 = vmatpush3.bf16.msra.mxu0 %v201_v25 }
  0x23   :  { %177 = vmatmul.mubr.f32.vlgmr.msra.gmra.mrb[0].mxu0 %v23_v28 }
  0xf6   :  { %v106_v29 = vpop.f32.mrb[0].mxu0 }
  0xf7   :  { %111 = vst.msk [vmem:[#allocation2] sm:$0xff] %vm110_vm1, %v106_v29  ;;  %v178_v30 = vpop.f32.mrb[1].mxu0 }
  0xf8   :  { %218 = shalt.err (!%p215_p4)
}
  0xf9   :  { %s219_s23 = scalar_lea.hbm %s324_s3, 128 }
  0xfa   :  { %p220_p5 = scmp.ne.s32.totalorder %s324_s3, %s219_s23  ;;  %p223_p6 = scmp.lt.u32.totalorder %s219_s23, %s324_s3 }
  0xfc   :  { %p225_p7 = pnand %p223_p6, %p220_p5 }
  0xfe   :  { %228 = shalt.err (!%p225_p7)
}
  0xff   :  { %121 = dma.vmem_to_hbm [thread:$0]  %s119_s22, 128, %s324_s3, [#allocation3]  }
 0x100   :  { %229 = dma.done.wait [#allocation3], 128  }
 0x101   :  { %230 = vsyncadd [#allocation3], 4294967168 }
 0x102   :  { %125 = vsyncpa [#allocation3], 1 }

</bundles_post_ra>
